<compile_context>
chip_gen: v7x
topology: tpu7x:2x2x1
jax: 0.10.0
libtpu: 0.0.40
codegen_flags: <defaults>
</compile_context>

<pallas_src>
import math

import jax
import jax.numpy as jnp
from jax.experimental import pallas as pl
from jax.experimental.pallas import tpu as pltpu

_LANE = 128
_SUBLANE = 8
_MAX_BLOCK_ROWS = 8192            # 8192 * 128 * 4 B = 4 MiB per f32 input block
_CHUNK_ROWS = 64                  # 8 vregs per input per fori_loop chunk
_VMEM_LIMIT_BYTES = 48 * 1024 * 1024


def _cdiv(a, b):
    return -(-a // b)


def _fold(v):
    """Fold an (r, 128) f32 chunk into (8, 128) partial sums."""
    r = v.shape[0]
    if r % _SUBLANE == 0:
        # Free regrouping of sublane rows; the axis-0 sum is vreg-wise VPU adds.
        return v.reshape(-1, _SUBLANE, _LANE).sum(axis=0)
    # Static remainder chunk (< _CHUNK_ROWS rows, not a sublane multiple): one
    # small cross-sublane reduce (XLU, hidden under DMA), placed in sublane 0.
    row = jnp.sum(v, axis=0, keepdims=True)                        # (1, 128)
    sub = jax.lax.broadcasted_iota(jnp.int32, (_SUBLANE, _LANE), 0)
    return jnp.where(sub == 0, jnp.broadcast_to(row, (_SUBLANE, _LANE)), 0.0)


def _make_kernel(*, block_rows, steps, rows, total_blocks, num_splits):
    chunk = min(_CHUNK_ROWS, block_rows)
    n_chunks = block_rows // chunk
    rem = block_rows - n_chunks * chunk            # static tail chunk (may be 0)
    # A step needs masking iff it can overhang the valid rows: ragged edge block
    # or a duplicated (clamped) overhang step of the 2-way split.  All static.
    has_masked = (rows % block_rows != 0) or (num_splits * steps > total_blocks)

    def kernel(x_ref, y_ref, out_ref):
        c = pl.program_id(0)                       # split (TensorCore) index
        s = pl.program_id(1)                       # sequential step within split

        @pl.when(s == 0)
        def _init():
            out_ref[...] = jnp.zeros(out_ref.shape, out_ref.dtype)

        # Un-clamped first row of this step; for a duplicated overhang step this
        # is >= rows, so the mask below zeroes its entire contribution.
        row0 = (c * steps + s) * block_rows

        def accumulate(masked):
            def add_chunk(r, nrows, carry):
                acc_i, acc_t = carry
                xc = x_ref[pl.ds(r, nrows), :].astype(jnp.float32)
                yc = y_ref[pl.ds(r, nrows), :].astype(jnp.float32)
                if masked:
                    rid = row0 + r + jax.lax.broadcasted_iota(
                        jnp.int32, (nrows, _LANE), 0)
                    ok = rid < rows
                    xc = jnp.where(ok, xc, 0.0)
                    yc = jnp.where(ok, yc, 0.0)
                return acc_i + _fold(xc * yc), acc_t + _fold(xc + yc)

            def body(i, carry):
                return add_chunk(pl.multiple_of(i * chunk, chunk), chunk, carry)

            zero = jnp.zeros((_SUBLANE, _LANE), jnp.float32)
            acc_i, acc_t = jax.lax.fori_loop(
                0, n_chunks, body, (zero, zero), unroll=min(4, n_chunks))
            if rem:
                acc_i, acc_t = add_chunk(n_chunks * chunk, rem, (acc_i, acc_t))
            out_ref[0] += acc_i
            out_ref[1] += acc_t

        if not has_masked:
            accumulate(False)                       # single code path, no compare
        else:
            is_full = row0 + block_rows <= rows     # scalar compare vs constant

            @pl.when(is_full)
            def _full():
                accumulate(False)

            @pl.when(jnp.logical_not(is_full))
            def _ragged():
                accumulate(True)

    return kernel


def iou_loss(inputs, targets, smooth=1.0):
    """Pallas equivalent of IoULoss.forward(inputs, targets, smooth)."""
    inputs = jnp.asarray(inputs)
    targets = jnp.asarray(targets)
    n = math.prod(inputs.shape[1:])                 # numel of inputs[0]

    if n % _LANE == 0:
        # Free row-major reshape of the FULL arrays; the kernel only ever reads
        # batch block 0, so no slice / pad / flatten copy hits HBM.
        rows = n // _LANE
        x3 = inputs.reshape(inputs.shape[0], rows, _LANE)
        y3 = targets.reshape(targets.shape[0], rows, _LANE)
    else:
        # TODO(synk): rare path (numel % 128 != 0) still pads/copies inputs[0]
        # and targets[0] once; a pl.ANY manual-DMA variant would avoid it too.
        pad = (-n) % _LANE
        rows = (n + pad) // _LANE
        x3 = jnp.pad(inputs[0].reshape(-1), (0, pad)).reshape(1, rows, _LANE)
        y3 = jnp.pad(targets[0].reshape(-1), (0, pad)).reshape(1, rows, _LANE)

    if rows > _MAX_BLOCK_ROWS:
        block_rows = _MAX_BLOCK_ROWS
        total_blocks = _cdiv(rows, block_rows)
    else:
        block_rows = rows
        total_blocks = 1

    # 2-way split of the row blocks feeds both TensorCores on v7x (a harmless
    # sequential outer loop on single-core v5e / v6e).  With an odd block count
    # the second split re-reads one fully-masked duplicate block, so only split
    # when that waste is zero (even count) or negligible (many blocks).
    if total_blocks >= 2 and (total_blocks % 2 == 0 or total_blocks >= 8):
        num_splits = 2
    else:
        num_splits = 1
    steps = _cdiv(total_blocks, num_splits)
    last_block = total_blocks - 1

    def in_map(c, s):
        # Clamp duplicated overhang steps of the 2-way split onto the last real
        # block; the kernel masks their contribution to zero.
        return (0, jnp.minimum(c * steps + s, last_block), 0)

    kernel = _make_kernel(block_rows=block_rows, steps=steps, rows=rows,
                          total_blocks=total_blocks, num_splits=num_splits)

    partials = pl.pallas_call(
        kernel,
        out_shape=jax.ShapeDtypeStruct((num_splits, 2, _SUBLANE, _LANE),
                                       jnp.float32),
        grid_spec=pltpu.PrefetchScalarGridSpec(
            num_scalar_prefetch=0,
            grid=(num_splits, steps),
            in_specs=[
                pl.BlockSpec((None, block_rows, _LANE), in_map),
                pl.BlockSpec((None, block_rows, _LANE), in_map),
            ],
            out_specs=pl.BlockSpec((None, 2, _SUBLANE, _LANE),
                                   lambda c, s: (c, 0, 0, 0)),
        ),
        # TODO(synk): on v7x, confirm (xprof / bundle dump) the leading
        # "parallel" axis really shards across both TensorCores; if not, switch
        # it to pltpu.CORE_PARALLEL.
        compiler_params=pltpu.CompilerParams(
            dimension_semantics=("parallel", "arbitrary"),
            vmem_limit_bytes=_VMEM_LIMIT_BYTES,
        ),
    )(x3, y3)

    # Tiny epilogue in XLA: one cross-lane reduce + the smooth arithmetic.
    intersection = jnp.sum(partials[:, 0])
    total = jnp.sum(partials[:, 1])
    union = total - intersection
    return 1.0 - (intersection + smooth) / (union + smooth)


def _reference_iou_loss(inputs, targets, smooth=1.0):
    x = inputs[0].reshape(-1).astype(jnp.float32)
    y = targets[0].reshape(-1).astype(jnp.float32)
    intersection = jnp.sum(x * y)
    total = jnp.sum(x + y)
    union = total - intersection
    return 1.0 - (intersection + smooth) / (union + smooth)


if __name__ == "__main__":
    key = jax.random.PRNGKey(0)
    k1, k2, k3, k4, k5, k6 = jax.random.split(key, 6)

    # Small NCHW inputs: batch=2, channels=4, spatial=16x16 (single block,
    # batch-0-only read through a batch>=2 operand, copy-free).
    inputs = jax.random.uniform(k1, (2, 4, 16, 16), dtype=jnp.float32)
    targets = (jax.random.uniform(k2, (2, 4, 16, 16)) > 0.5).astype(jnp.float32)
    loss = iou_loss(inputs, targets, smooth=1.0)
    jax.block_until_ready(loss)
    ref = _reference_iou_loss(inputs, targets, smooth=1.0)
    assert jnp.allclose(loss, ref, atol=1e-5, rtol=1e-5), (loss, ref)

    # Odd row count (105 rows of 128 lanes): exercises the static sub-chunk
    # tail and the non-multiple-of-8 fold, still copy-free.
    odd_in = jax.random.uniform(k3, (2, 3, 40, 112), dtype=jnp.float32)
    odd_tg = (jax.random.uniform(k4, (2, 3, 40, 112)) > 0.5).astype(jnp.float32)
    odd_loss = iou_loss(odd_in, odd_tg, smooth=1.0)
    jax.block_until_ready(odd_loss)
    odd_ref = _reference_iou_loss(odd_in, odd_tg, smooth=1.0)
    assert jnp.allclose(odd_loss, odd_ref, atol=1e-5, rtol=1e-5), (odd_loss, odd_ref)

    # Larger check: multi-block tiling, the 2-way parallel split, and the
    # in-kernel ragged-edge mask (14000 rows -> 2 blocks of 8192).
    big_in = jax.random.uniform(k5, (1, 7, 512, 500), dtype=jnp.float32)
    big_tg = (jax.random.uniform(k6, (1, 7, 512, 500)) > 0.5).astype(jnp.float32)
    big_loss = iou_loss(big_in, big_tg, smooth=1.0)
    jax.block_until_ready(big_loss)
    big_ref = _reference_iou_loss(big_in, big_tg, smooth=1.0)
    assert jnp.allclose(big_loss, big_ref, atol=1e-4, rtol=1e-4), (big_loss, big_ref)

    print("KERNEL_OK")
</pallas_src>

<mosaic_0001>
module attributes {stable_mosaic.version = 11 : i64} {
  func.func @kernel(%arg0: i32, %arg1: i32, %arg2: memref<1x8x128xf32, #tpu.memory_space<vmem>>, %arg3: memref<1x8x128xf32, #tpu.memory_space<vmem>>, %arg4: memref<1x2x8x128xf32, #tpu.memory_space<vmem>>) attributes {dimension_semantics = [#tpu.dimension_semantics<parallel>, #tpu.dimension_semantics<arbitrary>], iteration_bounds = array<i64: 1, 1>, scalar_prefetch = 0 : i64, scratch_operands = 0 : i64, tpu.core_type = #tpu.core_type<tc>, window_params = [{transform_indices = @transform_0, window_bounds = array<i64: 1, 8, 128>}, {transform_indices = @transform_1, window_bounds = array<i64: 1, 8, 128>}, {transform_indices = @transform_2, window_bounds = array<i64: 1, 2, 8, 128>}]} {
    %c0_i32 = arith.constant 0 : i32
    %0 = arith.cmpi eq, %arg1, %c0_i32 : i32
    %1 = arith.extui %0 : i1 to i32
    %c0_i32_0 = arith.constant 0 : i32
    %2 = arith.cmpi ne, %1, %c0_i32_0 : i32
    scf.if %2 {
      %cst_22 = arith.constant 0.000000e+00 : f32
      %32 = vector.broadcast %cst_22 : f32 to vector<2x8x128xf32>
      %c0_23 = arith.constant 0 : index
      %c0_24 = arith.constant 0 : index
      %c0_25 = arith.constant 0 : index
      %c0_26 = arith.constant 0 : index
      %33 = vector.load %arg4[%c0_23, %c0_24, %c0_25, %c0_26] : memref<1x2x8x128xf32, #tpu.memory_space<vmem>>, vector<1x2x8x128xf32>
      %34 = vector.shape_cast %33 : vector<1x2x8x128xf32> to vector<2x8x128xf32>
      %35 = vector.shape_cast %32 : vector<2x8x128xf32> to vector<1x2x8x128xf32>
      tpu.vector_store %arg4[%c0_23, %c0_24, %c0_25, %c0_26], %35 {strides = array<i32>} : memref<1x2x8x128xf32, #tpu.memory_space<vmem>>, vector<1x2x8x128xf32>,
    } else {
    }
    %cst = arith.constant 0.000000e+00 : f32
    %3 = vector.broadcast %cst : f32 to vector<8x128xf32>
    %c0_i32_1 = arith.constant 0 : i32
    %c8_i32 = arith.constant 8 : i32
    %4 = arith.muli %c0_i32_1, %c8_i32 : i32
    %5 = tpu.assume_multiple %4, 8 : i32
    %c0 = arith.constant 0 : index
    %6 = arith.index_cast %5 : i32 to index
    %c0_2 = arith.constant 0 : index
    %7 = vector.load %arg2[%c0, %6, %c0_2] : memref<1x8x128xf32, #tpu.memory_space<vmem>>, vector<1x8x128xf32>
    %8 = vector.shape_cast %7 : vector<1x8x128xf32> to vector<8x128xf32>
    %c0_3 = arith.constant 0 : index
    %9 = arith.index_cast %5 : i32 to index
    %c0_4 = arith.constant 0 : index
    %10 = vector.load %arg3[%c0_3, %9, %c0_4] : memref<1x8x128xf32, #tpu.memory_space<vmem>>, vector<1x8x128xf32>
    %11 = vector.shape_cast %10 : vector<1x8x128xf32> to vector<8x128xf32>
    %12 = arith.mulf %8, %11 : vector<8x128xf32>
    %13 = vector.shape_cast %12 : vector<8x128xf32> to vector<1x8x128xf32>
    %cst_5 = arith.constant dense<0.000000e+00> : vector<8x128xf32>
    %14 = vector.multi_reduction <add>, %13, %cst_5 [0] : vector<1x8x128xf32> to vector<8x128xf32>
    %15 = arith.addf %3, %14 : vector<8x128xf32>
    %16 = arith.addf %8, %11 : vector<8x128xf32>
    %17 = vector.shape_cast %16 : vector<8x128xf32> to vector<1x8x128xf32>
    %cst_6 = arith.constant dense<0.000000e+00> : vector<8x128xf32>
    %18 = vector.multi_reduction <add>, %17, %cst_6 [0] : vector<1x8x128xf32> to vector<8x128xf32>
    %19 = arith.addf %3, %18 : vector<8x128xf32>
    %c1_i32 = arith.constant 1 : i32
    %c0_7 = arith.constant 0 : index
    %c0_8 = arith.constant 0 : index
    %c0_9 = arith.constant 0 : index
    %c0_10 = arith.constant 0 : index
    %20 = vector.load %arg4[%c0_7, %c0_8, %c0_9, %c0_10] : memref<1x2x8x128xf32, #tpu.memory_space<vmem>>, vector<1x1x8x128xf32>
    %21 = vector.shape_cast %20 : vector<1x1x8x128xf32> to vector<8x128xf32>
    %22 = arith.addf %21, %15 : vector<8x128xf32>
    %c0_11 = arith.constant 0 : index
    %c0_12 = arith.constant 0 : index
    %c0_13 = arith.constant 0 : index
    %c0_14 = arith.constant 0 : index
    %23 = vector.load %arg4[%c0_11, %c0_12, %c0_13, %c0_14] : memref<1x2x8x128xf32, #tpu.memory_space<vmem>>, vector<1x1x8x128xf32>
    %24 = vector.shape_cast %23 : vector<1x1x8x128xf32> to vector<8x128xf32>
    %25 = vector.shape_cast %22 : vector<8x128xf32> to vector<1x1x8x128xf32>
    tpu.vector_store %arg4[%c0_11, %c0_12, %c0_13, %c0_14], %25 {strides = array<i32>} : memref<1x2x8x128xf32, #tpu.memory_space<vmem>>, vector<1x1x8x128xf32>,
    %c0_15 = arith.constant 0 : index
    %c1 = arith.constant 1 : index
    %c0_16 = arith.constant 0 : index
    %c0_17 = arith.constant 0 : index
    %26 = vector.load %arg4[%c0_15, %c1, %c0_16, %c0_17] : memref<1x2x8x128xf32, #tpu.memory_space<vmem>>, vector<1x1x8x128xf32>
    %27 = vector.shape_cast %26 : vector<1x1x8x128xf32> to vector<8x128xf32>
    %28 = arith.addf %27, %19 : vector<8x128xf32>
    %c0_18 = arith.constant 0 : index
    %c1_19 = arith.constant 1 : index
    %c0_20 = arith.constant 0 : index
    %c0_21 = arith.constant 0 : index
    %29 = vector.load %arg4[%c0_18, %c1_19, %c0_20, %c0_21] : memref<1x2x8x128xf32, #tpu.memory_space<vmem>>, vector<1x1x8x128xf32>
    %30 = vector.shape_cast %29 : vector<1x1x8x128xf32> to vector<8x128xf32>
    %31 = vector.shape_cast %28 : vector<8x128xf32> to vector<1x1x8x128xf32>
    tpu.vector_store %arg4[%c0_18, %c1_19, %c0_20, %c0_21], %31 {strides = array<i32>} : memref<1x2x8x128xf32, #tpu.memory_space<vmem>>, vector<1x1x8x128xf32>,
    return
  }
  func.func @transform_0(%arg0: i32, %arg1: i32) -> (i32, i32, i32) {
    %c1_i32 = arith.constant 1 : i32
    %0 = arith.muli %arg0, %c1_i32 : i32
    %1 = arith.addi %0, %arg1 : i32
    %c0_i32 = arith.constant 0 : i32
    %2 = arith.minsi %1, %c0_i32 : i32
    %c0_i32_0 = arith.constant 0 : i32
    %c0_i32_1 = arith.constant 0 : i32
    %c0_i32_2 = arith.constant 0 : i32
    return %c0_i32_0, %2, %c0_i32_1 : i32, i32, i32
  }
  func.func @transform_1(%arg0: i32, %arg1: i32) -> (i32, i32, i32) {
    %c1_i32 = arith.constant 1 : i32
    %0 = arith.muli %arg0, %c1_i32 : i32
    %1 = arith.addi %0, %arg1 : i32
    %c0_i32 = arith.constant 0 : i32
    %2 = arith.minsi %1, %c0_i32 : i32
    %c0_i32_0 = arith.constant 0 : i32
    %c0_i32_1 = arith.constant 0 : i32
    %c0_i32_2 = arith.constant 0 : i32
    return %c0_i32_0, %2, %c0_i32_1 : i32, i32, i32
  }
  func.func @transform_2(%arg0: i32, %arg1: i32) -> (i32, i32, i32, i32) {
    %c0_i32 = arith.constant 0 : i32
    %c0_i32_0 = arith.constant 0 : i32
    %c0_i32_1 = arith.constant 0 : i32
    %c0_i32_2 = arith.constant 0 : i32
    return %arg0, %c0_i32, %c0_i32_0, %c0_i32_1 : i32, i32, i32, i32
  }
}

</mosaic_0001>

<bundles_post_ra>
// kernel: tpu_custom_call.1
= control target key start
LH: loop header
LB: loop body
LE: loop exit
PB: predicated region body
PF: predicated region fallthrough
CT: control target
= control target key end

     0   :  { %7 = vsyncpa [#allocation3], 0  ;;  %s242_s0 = inlined_call_operand.hbm [shape: f32[2,8,128], index: 0, kind: input, shape index: {}]   ;;  %s243_s1 = inlined_call_operand.hbm [shape: f32[2,8,128], index: 1, kind: input, shape index: {}]   ;;  %s244_s2 = inlined_call_operand.hbm [shape: f32[1,2,8,128], index: 2, kind: output, shape index: {}]  }
   0x1   :  { %8 = vsyncpa [#allocation6], 0 }
   0x2   :  { %9 = vsyncpa [#allocation4], 0  ;;  %s173_s9 = smov [#allocation2]   ;;  %s174_s11 = smov [#allocation5]  }
   0x3   :  { %s21_s10 = sshll.u32 %s173_s9, 4  ;;  %s36_s12 = sshll.u32 %s174_s11, 4  ;;  %s22_s10 = int_to_ptr.vmem [resolvable:$true] %s21_s10  ;;  %s193_s12 = int_to_ptr.vmem [resolvable:$true] %s36_s12 }
   0x4   :  { %s101_s15 = scalar_lea.hbm %s242_s0, 128  ;;  %s103_s20 = scalar_lea.hbm %s242_s0, 256 }
   0x5   :  { %p102_p0 = scmp.ne.s32.totalorder %s242_s0, %s101_s15  ;;  %p104_p1 = scmp.lt.u32.totalorder %s103_s20, %s101_s15 }
   0x6   :  { %p105_p2 = scmp.lt.u32.totalorder %s101_s15, %s242_s0 }
   0x8   :  { %p106_p3 = por %p105_p2, %p104_p1 }
   0xa   :  { %p107_p4 = pnand %p106_p3, %p102_p0 }
   0xc   :  { %110 = shalt.err (!%p107_p4)
}
   0xd   :  { %s111_s23 = scalar_lea.vmem %s22_s10, 128  ;;  %p116_p6 = scmp.lt.s32.totalorder %s22_s10, %s22_s10 }
   0xe   :  { %p112_p5 = scmp.ne.s32.totalorder %s22_s10, %s111_s23  ;;  %p117_p7 = scmp.lt.s32.totalorder %s111_s23, %s111_s23 }
  0x10   :  { %p118_p8 = por %p117_p7, %p116_p6 }
  0x12   :  { %p119_p9 = pnand %p118_p8, %p112_p5 }
  0x14   :  { %122 = shalt.err (!%p119_p9)
}
  0x15   :  { %24 = dma.hbm_to_vmem [thread:$0]  %s242_s0, 128, %s22_s10, [#allocation3]  }
  0x16   :  { %s123_s28 = scalar_lea.hbm %s243_s1, 128  ;;  %s125_s5 = scalar_lea.hbm %s243_s1, 256 }
  0x17   :  { %p124_p10 = scmp.ne.s32.totalorder %s243_s1, %s123_s28  ;;  %p126_p11 = scmp.lt.u32.totalorder %s125_s5, %s123_s28 }
  0x18   :  { %p127_p12 = scmp.lt.u32.totalorder %s123_s28, %s243_s1 }
  0x1a   :  { %p128_p13 = por %p127_p12, %p126_p11 }
  0x1c   :  { %p129_p0 = pnand %p128_p13, %p124_p10 }
  0x1e   :  { %132 = shalt.err (!%p129_p0)
}
  0x1f   :  { %s133_s0 = scalar_lea.vmem %s193_s12, 128  ;;  %p138_p2 = scmp.lt.s32.totalorder %s193_s12, %s193_s12 }
  0x20   :  { %p134_p1 = scmp.ne.s32.totalorder %s193_s12, %s133_s0  ;;  %p139_p3 = scmp.lt.s32.totalorder %s133_s0, %s133_s0 }
  0x22   :  { %p140_p4 = por %p139_p3, %p138_p2 }
  0x24   :  { %p141_p5 = pnand %p140_p4, %p134_p1 }
  0x26   :  { %144 = shalt.err (!%p141_p5)
}
  0x27   :  { %39 = dma.hbm_to_vmem [thread:$0]  %s243_s1, 128, %s193_s12, [#allocation6]  }
  0x28   :  { %167 = dma.done.wait [#allocation3], 128  }
  0x29   :  { %168 = vsyncadd [#allocation3], 4294967168 }
  0x2a   :  { %169 = dma.done.wait [#allocation6], 128  }
  0x2b   :  { %170 = vsyncadd [#allocation6], 4294967168  ;;  %v58_v0 = vld [vmem:[#allocation2] sm:$0xff]  ;;  %v59_v1 = vld [vmem:[#allocation5] sm:$0xff]  ;;  %s175_s10 = smov [#allocation7]  }
  0x2c   :  { %s78_s11 = sshll.u32 %s175_s10, 4  ;;  %v60_v2 = vmul.f32 %v59_v1, %v58_v0  ;;  %v63_v3 = vadd.f32 %v59_v1, %v58_v0  ;;  %s79_s11 = int_to_ptr.vmem [resolvable:$true] %s78_s11 }
  0x2d   :  { %s145_s13 = scalar_lea.vmem %s79_s11, 256  ;;  %p150_p7 = scmp.lt.s32.totalorder %s79_s11, %s79_s11 }
  0x2e   :  { %68 = vst [vmem:[#allocation7] sm:$0xff] %v60_v2  ;;  %72 = vst [vmem:[#allocation7 + $0x8] sm:$0xff] %v63_v3  ;;  %p146_p6 = scmp.ne.s32.totalorder %s79_s11, %s145_s13  ;;  %p151_p8 = scmp.lt.s32.totalorder %s145_s13, %s145_s13 }
  0x30   :  { %p152_p9 = por %p151_p8, %p150_p7 }
  0x32   :  { %p153_p10 = pnand %p152_p9, %p146_p6 }
  0x34   :  { %156 = shalt.err (!%p153_p10)
}
  0x35   :  { %s157_s14 = scalar_lea.hbm %s244_s2, 256 }
  0x36   :  { %p158_p11 = scmp.ne.s32.totalorder %s244_s2, %s157_s14  ;;  %p161_p12 = scmp.lt.u32.totalorder %s157_s14, %s244_s2 }
  0x38   :  { %p163_p13 = pnand %p161_p12, %p158_p11 }
  0x3a   :  { %166 = shalt.err (!%p163_p13)
}
  0x3b   :  { %s176_s19 = smov 128   ;;  %s177_s20 = smov 8  }
  0x3c   :  { %84 = dma.vmem_to_hbm [thread:$0]  %s79_s11, 256, %s244_s2, [#allocation4], %s176_s19, %s176_s19, %s177_s20  }
  0x3d   :  { %171 = dma.done.wait [#allocation4], 256  }
  0x3e   :  { %172 = vsyncadd [#allocation4], 4294967040 }
  0x3f   :  { %88 = vsyncpa [#allocation3], 1 }
  0x40   :  { %89 = vsyncpa [#allocation6], 1 }
  0x41   :  { %90 = vsyncpa [#allocation4], 1 }

</bundles_post_ra>
